<compile_context>
chip_gen: v7x
topology: tpu7x:2x2x1
jax: 0.10.0
libtpu: 0.0.40
codegen_flags: <defaults>
</compile_context>

<pallas_src>
import jax
import jax.numpy as jnp
from jax.experimental import pallas as pl
from jax.experimental.pallas import tpu as pltpu

D_IN = 300      # fc1 in / fc4 out
D_H = 150       # hidden
D_IN_P = 384    # 300 padded to lane multiple
D_H_P = 256     # 150 padded to lane multiple
D_Z_P = 128     # combined (mu | logvar) padded lane width
HALF = 64       # mu block = lanes [0,64), logvar block = lanes [64,128)


def _round_up(a, m):
    return (a + m - 1) // m * m


def vae_kernel(x_ref, eps_ref,
               w1_ref, b1_ref,
               w2_ref, b2_ref,     # merged fc21||fc22
               w3_ref, b3_ref,     # fc3, duplicated across mu / eps*std blocks
               w4_ref, b4_ref,
               recon_ref, mulv_ref):
    x = x_ref[...]                                               # bf16 activations

    # ---- encode ----
    h1 = jnp.dot(x, w1_ref[...],
                 preferred_element_type=jnp.float32) + b1_ref[...]
    h1 = jnp.maximum(h1, 0.0)                                    # F.relu (f32)

    # single matmul for both heads; lanes [0,64)=mu, [64,128)=logvar (zero-padded)
    mulv = jnp.dot(h1.astype(jnp.bfloat16), w2_ref[...],
                   preferred_element_type=jnp.float32) + b2_ref[...]
    mulv_ref[...] = mulv                                         # lane-dense f32 store

    # ---- reparameterize: z = mu + eps * exp(0.5 * logvar) ----
    col = jax.lax.broadcasted_iota(jnp.int32, mulv.shape, 1)
    is_mu = col < HALF
    half_lv = jnp.where(is_mu, 0.0, 0.5 * mulv)                  # 0 in mu/padding lanes
    std = jnp.exp(half_lv)                                       # 1.0 where masked
    eps = eps_ref[...].astype(jnp.float32)                       # zero outside [64,64+ln)
    # z_ext = [ mu | eps*std ]; fc3 weight is duplicated so the matmul sums the blocks.
    z_ext = jnp.where(is_mu, mulv, eps * std).astype(jnp.bfloat16)

    # ---- decode ----
    h3 = jnp.dot(z_ext, w3_ref[...],
                 preferred_element_type=jnp.float32) + b3_ref[...]
    h3 = jnp.maximum(h3, 0.0)                                    # F.relu
    logits = jnp.dot(h3.astype(jnp.bfloat16), w4_ref[...],
                     preferred_element_type=jnp.float32) + b4_ref[...]
    # sigmoid(x) == 0.5*tanh(0.5*x) + 0.5  -> single EUP transcendental
    recon = 0.5 * jnp.tanh(0.5 * logits) + 0.5
    recon_ref[...] = recon.astype(recon_ref.dtype)


def pack_params(p, ln):
    """Pad to lane-aligned shapes, merge fc21/fc22, duplicate fc3, cast weights to bf16."""
    assert ln <= HALF, "latent size must fit in one 64-lane block"

    def pad2(a, shape):
        return jnp.zeros(shape, jnp.float32).at[: a.shape[0], : a.shape[1]].set(a)

    w1 = pad2(p["w1"], (D_IN_P, D_H_P)).astype(jnp.bfloat16)
    b1 = pad2(p["b1"], (1, D_H_P))

    w2 = (jnp.zeros((D_H_P, D_Z_P), jnp.float32)
          .at[:D_H, :ln].set(p["w21"])
          .at[:D_H, HALF:HALF + ln].set(p["w22"])
          .astype(jnp.bfloat16))
    b2 = (jnp.zeros((1, D_Z_P), jnp.float32)
          .at[:, :ln].set(p["b21"])
          .at[:, HALF:HALF + ln].set(p["b22"]))

    w3 = (jnp.zeros((D_Z_P, D_H_P), jnp.float32)
          .at[:ln, :D_H].set(p["w3"])
          .at[HALF:HALF + ln, :D_H].set(p["w3"])     # duplicate: block-sum == mu + eps*std
          .astype(jnp.bfloat16))
    b3 = pad2(p["b3"], (1, D_H_P))

    w4 = pad2(p["w4"], (D_H_P, D_IN_P)).astype(jnp.bfloat16)
    b4 = pad2(p["b4"], (1, D_IN_P))
    return (w1, b1, w2, b2, w3, b3, w4, b4)


def _pick_tile(B):
    """Batch tile: large for DMA efficiency, multiple of 16 (bf16 sublanes),
    and >=2 grid steps when the batch allows (v7x dual TensorCore)."""
    if B >= 512:
        TB = 512
    else:
        TB = _round_up(B, 16)
    B_pad = _round_up(B, TB)
    if B_pad == TB and B_pad % 32 == 0 and B_pad >= 64:
        TB = B_pad // 2            # ensure >=2 grid steps for the parallel axis
    return TB, B_pad


def vae_forward(x, eps, packed, ln):
    """x: (B, 300) f32, eps: (B, ln) f32, packed: output of pack_params."""
    B = x.shape[0]
    TB, B_pad = _pick_tile(B)

    # bf16 activation streams (halves the dominant HBM traffic at large batch)
    x_p = (jnp.zeros((B_pad, D_IN_P), jnp.float32)
           .at[:B, :D_IN].set(x).astype(jnp.bfloat16))
    eps_p = (jnp.zeros((B_pad, D_Z_P), jnp.float32)
             .at[:B, HALF:HALF + ln].set(eps).astype(jnp.bfloat16))

    grid = (B_pad // TB,)

    def batch_spec(width):
        return pl.BlockSpec((TB, width), lambda i: (i, 0))

    def resident_spec(shape):
        return pl.BlockSpec(shape, lambda i: (0, 0))   # weights stay VMEM-resident

    in_specs = [batch_spec(D_IN_P), batch_spec(D_Z_P)] + \
               [resident_spec(a.shape) for a in packed]
    out_specs = (batch_spec(D_IN_P), batch_spec(D_Z_P))
    out_shape = (jax.ShapeDtypeStruct((B_pad, D_IN_P), jnp.bfloat16),   # recon (bf16)
                 jax.ShapeDtypeStruct((B_pad, D_Z_P), jnp.float32))     # mu|logvar (f32)

    per_row_flops = 2 * (D_IN_P * D_H_P + D_H_P * D_Z_P + D_Z_P * D_H_P + D_H_P * D_IN_P)
    weight_bytes = 2 * (D_IN_P * D_H_P + D_H_P * D_Z_P + D_Z_P * D_H_P + D_H_P * D_IN_P) \
        + 4 * (D_H_P + D_Z_P + D_H_P + D_IN_P)
    act_bytes = B_pad * (2 * D_IN_P + 2 * D_Z_P + 2 * D_IN_P + 4 * D_Z_P)
    cost = pl.CostEstimate(flops=B_pad * per_row_flops,
                           transcendentals=B_pad * (D_Z_P + D_IN_P),
                           bytes_accessed=act_bytes + weight_bytes)

    recon_p, mulv_p = pl.pallas_call(
        vae_kernel,
        grid=grid,
        in_specs=in_specs,
        out_specs=out_specs,
        out_shape=out_shape,
        compiler_params=pltpu.CompilerParams(dimension_semantics=("parallel",)),
        cost_estimate=cost,
    )(x_p, eps_p, *packed)

    recon = recon_p[:B, :D_IN].astype(jnp.float32)
    mu = mulv_p[:B, :ln]
    logvar = mulv_p[:B, HALF:HALF + ln]
    return recon, mu, logvar


def init_params(key, ln):
    """Deterministic init mimicking torch.nn.Linear's U(-1/sqrt(fan_in), 1/sqrt(fan_in))."""
    def linear(k, fan_in, fan_out):
        kw, kb = jax.random.split(k)
        bound = 1.0 / jnp.sqrt(fan_in)
        w = jax.random.uniform(kw, (fan_in, fan_out), jnp.float32, -bound, bound)
        b = jax.random.uniform(kb, (1, fan_out), jnp.float32, -bound, bound)
        return w, b

    k1, k21, k22, k3, k4 = jax.random.split(key, 5)
    w1, b1 = linear(k1, D_IN, D_H)
    w21, b21 = linear(k21, D_H, ln)
    w22, b22 = linear(k22, D_H, ln)
    w3, b3 = linear(k3, ln, D_H)
    w4, b4 = linear(k4, D_H, D_IN)
    return {"w1": w1, "b1": b1, "w21": w21, "b21": b21, "w22": w22, "b22": b22,
            "w3": w3, "b3": b3, "w4": w4, "b4": b4}


def vae_reference(x, eps, p):
    """Pure-JAX reference mirroring the kernel's bf16 weight *and* activation
    quantization (f32 accumulation), so tolerances stay tight."""
    q = lambda a: a.astype(jnp.bfloat16).astype(jnp.float32)
    dot = lambda a, b: jnp.dot(a, b, precision=jax.lax.Precision.HIGHEST)
    xq = q(x)
    epsq = q(eps)
    h1 = jnp.maximum(dot(xq, q(p["w1"])) + p["b1"], 0.0)
    h1q = q(h1)
    mu = dot(h1q, q(p["w21"])) + p["b21"]
    logvar = dot(h1q, q(p["w22"])) + p["b22"]
    z = q(mu) + q(epsq * jnp.exp(0.5 * logvar))
    h3 = jnp.maximum(dot(z, q(p["w3"])) + p["b3"], 0.0)
    recon = jax.nn.sigmoid(dot(q(h3), q(p["w4"])) + p["b4"])
    return recon, mu, logvar


if __name__ == "__main__":
    key = jax.random.PRNGKey(0)
    k_params, k_x, k_eps = jax.random.split(key, 3)

    ln = 20      # latent size (module's `ln` ctor arg)
    B = 8        # batch after x.view(-1, 300)

    params = init_params(k_params, ln)
    x = jax.random.normal(k_x, (B, D_IN), jnp.float32)
    eps = jax.random.normal(k_eps, (B, ln), jnp.float32)   # torch.randn_like(std)

    packed = pack_params(params, ln)
    recon, mu, logvar = vae_forward(x, eps, packed, ln)
    jax.block_until_ready((recon, mu, logvar))

    r_ref, m_ref, lv_ref = vae_reference(x, eps, params)
    assert recon.shape == (B, D_IN) and mu.shape == (B, ln) and logvar.shape == (B, ln)
    # mu/logvar: f32-accumulated bf16 matmuls, f32 store -> tight tolerance.
    assert jnp.allclose(mu, m_ref, atol=3e-3, rtol=3e-3), float(jnp.max(jnp.abs(mu - m_ref)))
    assert jnp.allclose(logvar, lv_ref, atol=3e-3, rtol=3e-3), float(jnp.max(jnp.abs(logvar - lv_ref)))
    # recon is streamed back in bf16 (quantization ~4e-3 near 1.0) -> looser tolerance.
    assert jnp.allclose(recon, r_ref, atol=1e-2, rtol=1e-2), float(jnp.max(jnp.abs(recon - r_ref)))

    print("KERNEL_OK")
</pallas_src>

<mosaic_0001>
module attributes {stable_mosaic.version = 11 : i64} {
  func.func @vae_kernel(%arg0: i32, %arg1: memref<16x384xbf16, #tpu.memory_space<vmem>>, %arg2: memref<16x128xbf16, #tpu.memory_space<vmem>>, %arg3: memref<384x256xbf16, #tpu.memory_space<vmem>>, %arg4: memref<1x256xf32, #tpu.memory_space<vmem>>, %arg5: memref<256x128xbf16, #tpu.memory_space<vmem>>, %arg6: memref<1x128xf32, #tpu.memory_space<vmem>>, %arg7: memref<128x256xbf16, #tpu.memory_space<vmem>>, %arg8: memref<1x256xf32, #tpu.memory_space<vmem>>, %arg9: memref<256x384xbf16, #tpu.memory_space<vmem>>, %arg10: memref<1x384xf32, #tpu.memory_space<vmem>>, %arg11: memref<16x384xbf16, #tpu.memory_space<vmem>>, %arg12: memref<16x128xf32, #tpu.memory_space<vmem>>) attributes {dimension_semantics = [#tpu.dimension_semantics<parallel>], iteration_bounds = array<i64: 1>, scalar_prefetch = 0 : i64, scratch_operands = 0 : i64, tpu.core_type = #tpu.core_type<tc>, window_params = [{transform_indices = @transform_0, window_bounds = array<i64: 16, 384>}, {transform_indices = @transform_1, window_bounds = array<i64: 16, 128>}, {pipeline_mode = #tpu.pipeline_mode<synchronous>, transform_indices = @transform_2, window_bounds = array<i64: 384, 256>}, {pipeline_mode = #tpu.pipeline_mode<synchronous>, transform_indices = @transform_3, window_bounds = array<i64: 1, 256>}, {pipeline_mode = #tpu.pipeline_mode<synchronous>, transform_indices = @transform_4, window_bounds = array<i64: 256, 128>}, {pipeline_mode = #tpu.pipeline_mode<synchronous>, transform_indices = @transform_5, window_bounds = array<i64: 1, 128>}, {pipeline_mode = #tpu.pipeline_mode<synchronous>, transform_indices = @transform_6, window_bounds = array<i64: 128, 256>}, {pipeline_mode = #tpu.pipeline_mode<synchronous>, transform_indices = @transform_7, window_bounds = array<i64: 1, 256>}, {pipeline_mode = #tpu.pipeline_mode<synchronous>, transform_indices = @transform_8, window_bounds = array<i64: 256, 384>}, {pipeline_mode = #tpu.pipeline_mode<synchronous>, transform_indices = @transform_9, window_bounds = array<i64: 1, 384>}, {transform_indices = @transform_10, window_bounds = array<i64: 16, 384>}, {transform_indices = @transform_11, window_bounds = array<i64: 16, 128>}]} {
    %c0 = arith.constant 0 : index
    %c0_0 = arith.constant 0 : index
    %0 = vector.load %arg1[%c0, %c0_0] : memref<16x384xbf16, #tpu.memory_space<vmem>>, vector<16x384xbf16>
    %c0_1 = arith.constant 0 : index
    %c0_2 = arith.constant 0 : index
    %1 = vector.load %arg3[%c0_1, %c0_2] : memref<384x256xbf16, #tpu.memory_space<vmem>>, vector<384x256xbf16>
    %cst = arith.constant dense<0.000000e+00> : vector<16x256xf32>
    %2 = tpu.matmul %0, %1, %cst {dimension_numbers = #tpu.dot_dimension_numbers<[1], [0], [0], [1], [0, 0, 1, 1], [], []>} : vector<16x384xbf16>, vector<384x256xbf16>, vector<16x256xf32> -> vector<16x256xf32>
    %c0_3 = arith.constant 0 : index
    %c0_4 = arith.constant 0 : index
    %3 = vector.load %arg4[%c0_3, %c0_4] : memref<1x256xf32, #tpu.memory_space<vmem>>, vector<1x256xf32>
    %4 = vector.broadcast %3 : vector<1x256xf32> to vector<16x256xf32>
    %5 = arith.addf %2, %4 : vector<16x256xf32>
    %cst_5 = arith.constant 0.000000e+00 : f32
    %6 = vector.broadcast %cst_5 : f32 to vector<16x256xf32>
    %7 = arith.maximumf %5, %6 : vector<16x256xf32>
    %8 = arith.truncf %7 : vector<16x256xf32> to vector<16x256xbf16>
    %c0_6 = arith.constant 0 : index
    %c0_7 = arith.constant 0 : index
    %9 = vector.load %arg5[%c0_6, %c0_7] : memref<256x128xbf16, #tpu.memory_space<vmem>>, vector<256x128xbf16>
    %cst_8 = arith.constant dense<0.000000e+00> : vector<16x128xf32>
    %10 = tpu.matmul %8, %9, %cst_8 {dimension_numbers = #tpu.dot_dimension_numbers<[1], [0], [0], [1], [0, 0, 1, 1], [], []>} : vector<16x256xbf16>, vector<256x128xbf16>, vector<16x128xf32> -> vector<16x128xf32>
    %c0_9 = arith.constant 0 : index
    %c0_10 = arith.constant 0 : index
    %11 = vector.load %arg6[%c0_9, %c0_10] : memref<1x128xf32, #tpu.memory_space<vmem>>, vector<1x128xf32>
    %12 = vector.broadcast %11 : vector<1x128xf32> to vector<16x128xf32>
    %13 = arith.addf %10, %12 : vector<16x128xf32>
    %c0_11 = arith.constant 0 : index
    %c0_12 = arith.constant 0 : index
    %14 = vector.load %arg12[%c0_11, %c0_12] : memref<16x128xf32, #tpu.memory_space<vmem>>, vector<16x128xf32>
    tpu.vector_store %arg12[%c0_11, %c0_12], %13 {strides = array<i32>} : memref<16x128xf32, #tpu.memory_space<vmem>>, vector<16x128xf32>,
    %15 = tpu.iota {dimensions = array<i32: 1>} : vector<16x128xi32>
    %c64_i32 = arith.constant 64 : i32
    %16 = vector.broadcast %c64_i32 : i32 to vector<16x128xi32>
    %17 = arith.cmpi slt, %15, %16 : vector<16x128xi32>
    %cst_13 = arith.constant 5.000000e-01 : f32
    %18 = vector.broadcast %cst_13 : f32 to vector<16x128xf32>
    %19 = arith.mulf %18, %13 : vector<16x128xf32>
    %cst_14 = arith.constant 0.000000e+00 : f32
    %20 = vector.broadcast %cst_14 : f32 to vector<16x128xf32>
    %21 = arith.select %17, %20, %19 : vector<16x128xi1>, vector<16x128xf32>
    %22 = math.exp %21 : vector<16x128xf32>
    %c0_15 = arith.constant 0 : index
    %c0_16 = arith.constant 0 : index
    %23 = vector.load %arg2[%c0_15, %c0_16] : memref<16x128xbf16, #tpu.memory_space<vmem>>, vector<16x128xbf16>
    %24 = arith.extf %23 : vector<16x128xbf16> to vector<16x128xf32>
    %25 = arith.mulf %24, %22 : vector<16x128xf32>
    %26 = arith.select %17, %13, %25 : vector<16x128xi1>, vector<16x128xf32>
    %27 = arith.truncf %26 : vector<16x128xf32> to vector<16x128xbf16>
    %c0_17 = arith.constant 0 : index
    %c0_18 = arith.constant 0 : index
    %28 = vector.load %arg7[%c0_17, %c0_18] : memref<128x256xbf16, #tpu.memory_space<vmem>>, vector<128x256xbf16>
    %cst_19 = arith.constant dense<0.000000e+00> : vector<16x256xf32>
    %29 = tpu.matmul %27, %28, %cst_19 {dimension_numbers = #tpu.dot_dimension_numbers<[1], [0], [0], [1], [0, 0, 1, 1], [], []>} : vector<16x128xbf16>, vector<128x256xbf16>, vector<16x256xf32> -> vector<16x256xf32>
    %c0_20 = arith.constant 0 : index
    %c0_21 = arith.constant 0 : index
    %30 = vector.load %arg8[%c0_20, %c0_21] : memref<1x256xf32, #tpu.memory_space<vmem>>, vector<1x256xf32>
    %31 = vector.broadcast %30 : vector<1x256xf32> to vector<16x256xf32>
    %32 = arith.addf %29, %31 : vector<16x256xf32>
    %cst_22 = arith.constant 0.000000e+00 : f32
    %33 = vector.broadcast %cst_22 : f32 to vector<16x256xf32>
    %34 = arith.maximumf %32, %33 : vector<16x256xf32>
    %35 = arith.truncf %34 : vector<16x256xf32> to vector<16x256xbf16>
    %c0_23 = arith.constant 0 : index
    %c0_24 = arith.constant 0 : index
    %36 = vector.load %arg9[%c0_23, %c0_24] : memref<256x384xbf16, #tpu.memory_space<vmem>>, vector<256x384xbf16>
    %cst_25 = arith.constant dense<0.000000e+00> : vector<16x384xf32>
    %37 = tpu.matmul %35, %36, %cst_25 {dimension_numbers = #tpu.dot_dimension_numbers<[1], [0], [0], [1], [0, 0, 1, 1], [], []>} : vector<16x256xbf16>, vector<256x384xbf16>, vector<16x384xf32> -> vector<16x384xf32>
    %c0_26 = arith.constant 0 : index
    %c0_27 = arith.constant 0 : index
    %38 = vector.load %arg10[%c0_26, %c0_27] : memref<1x384xf32, #tpu.memory_space<vmem>>, vector<1x384xf32>
    %39 = vector.broadcast %38 : vector<1x384xf32> to vector<16x384xf32>
    %40 = arith.addf %37, %39 : vector<16x384xf32>
    %cst_28 = arith.constant 5.000000e-01 : f32
    %41 = vector.broadcast %cst_28 : f32 to vector<16x384xf32>
    %42 = arith.mulf %41, %40 : vector<16x384xf32>
    %43 = math.tanh %42 : vector<16x384xf32>
    %cst_29 = arith.constant 5.000000e-01 : f32
    %44 = vector.broadcast %cst_29 : f32 to vector<16x384xf32>
    %45 = arith.mulf %44, %43 : vector<16x384xf32>
    %cst_30 = arith.constant 5.000000e-01 : f32
    %46 = vector.broadcast %cst_30 : f32 to vector<16x384xf32>
    %47 = arith.addf %45, %46 : vector<16x384xf32>
    %48 = arith.truncf %47 : vector<16x384xf32> to vector<16x384xbf16>
    %c0_31 = arith.constant 0 : index
    %c0_32 = arith.constant 0 : index
    %49 = vector.load %arg11[%c0_31, %c0_32] : memref<16x384xbf16, #tpu.memory_space<vmem>>, vector<16x384xbf16>
    tpu.vector_store %arg11[%c0_31, %c0_32], %48 {strides = array<i32>} : memref<16x384xbf16, #tpu.memory_space<vmem>>, vector<16x384xbf16>,
    return
  }
  func.func @transform_0(%arg0: i32) -> (i32, i32) {
    %c0_i32 = arith.constant 0 : i32
    %c0_i32_0 = arith.constant 0 : i32
    return %arg0, %c0_i32 : i32, i32
  }
  func.func @transform_1(%arg0: i32) -> (i32, i32) {
    %c0_i32 = arith.constant 0 : i32
    %c0_i32_0 = arith.constant 0 : i32
    return %arg0, %c0_i32 : i32, i32
  }
  func.func @transform_2(%arg0: i32) -> (i32, i32) {
    %c0_i32 = arith.constant 0 : i32
    %c0_i32_0 = arith.constant 0 : i32
    %c0_i32_1 = arith.constant 0 : i32
    return %c0_i32, %c0_i32_0 : i32, i32
  }
  func.func @transform_3(%arg0: i32) -> (i32, i32) {
    %c0_i32 = arith.constant 0 : i32
    %c0_i32_0 = arith.constant 0 : i32
    %c0_i32_1 = arith.constant 0 : i32
    return %c0_i32, %c0_i32_0 : i32, i32
  }
  func.func @transform_4(%arg0: i32) -> (i32, i32) {
    %c0_i32 = arith.constant 0 : i32
    %c0_i32_0 = arith.constant 0 : i32
    %c0_i32_1 = arith.constant 0 : i32
    return %c0_i32, %c0_i32_0 : i32, i32
  }
  func.func @transform_5(%arg0: i32) -> (i32, i32) {
    %c0_i32 = arith.constant 0 : i32
    %c0_i32_0 = arith.constant 0 : i32
    %c0_i32_1 = arith.constant 0 : i32
    return %c0_i32, %c0_i32_0 : i32, i32
  }
  func.func @transform_6(%arg0: i32) -> (i32, i32) {
    %c0_i32 = arith.constant 0 : i32
    %c0_i32_0 = arith.constant 0 : i32
    %c0_i32_1 = arith.constant 0 : i32
    return %c0_i32, %c0_i32_0 : i32, i32
  }
  func.func @transform_7(%arg0: i32) -> (i32, i32) {
    %c0_i32 = arith.constant 0 : i32
    %c0_i32_0 = arith.constant 0 : i32
    %c0_i32_1 = arith.constant 0 : i32
    return %c0_i32, %c0_i32_0 : i32, i32
  }
  func.func @transform_8(%arg0: i32) -> (i32, i32) {
    %c0_i32 = arith.constant 0 : i32
    %c0_i32_0 = arith.constant 0 : i32
    %c0_i32_1 = arith.constant 0 : i32
    return %c0_i32, %c0_i32_0 : i32, i32
  }
  func.func @transform_9(%arg0: i32) -> (i32, i32) {
    %c0_i32 = arith.constant 0 : i32
    %c0_i32_0 = arith.constant 0 : i32
    %c0_i32_1 = arith.constant 0 : i32
    return %c0_i32, %c0_i32_0 : i32, i32
  }
  func.func @transform_10(%arg0: i32) -> (i32, i32) {
    %c0_i32 = arith.constant 0 : i32
    %c0_i32_0 = arith.constant 0 : i32
    return %arg0, %c0_i32 : i32, i32
  }
  func.func @transform_11(%arg0: i32) -> (i32, i32) {
    %c0_i32 = arith.constant 0 : i32
    %c0_i32_0 = arith.constant 0 : i32
    return %arg0, %c0_i32 : i32, i32
  }
}

</mosaic_0001>

<bundles_post_ra>
// kernel: tpu_custom_call.1
= control target key start
LH: loop header
LB: loop body
LE: loop exit
PB: predicated region body
PF: predicated region fallthrough
CT: control target
= control target key end

     0   :  { %17 = vsyncpa [#allocation3], 0  ;;  %s2220_s0 = inlined_call_operand.hbm [shape: bf16[16,384], index: 0, kind: input, shape index: {}]   ;;  %s2221_s1 = inlined_call_operand.hbm [shape: bf16[16,128], index: 1, kind: input, shape index: {}]   ;;  %s2222_s2 = inlined_call_operand.hbm [shape: bf16[384,256], index: 2, kind: input, shape index: {}]   ;;  %s2223_s3 = inlined_call_operand.vmem [shape: f32[1,256], index: 3, kind: input, shape index: {}]   ;;  %s2224_s4 = inlined_call_operand.hbm [shape: bf16[256,128], index: 4, kind: input, shape index: {}]   ;;  %s2225_s5 = inlined_call_operand.vmem [shape: f32[1,128], index: 5, kind: input, shape index: {}]   ;;  %s2226_s6 = inlined_call_operand.hbm [shape: bf16[128,256], index: 6, kind: input, shape index: {}]   ;;  %s2227_s7 = inlined_call_operand.vmem [shape: f32[1,256], index: 7, kind: input, shape index: {}]   ;;  %s2228_s8 = inlined_call_operand.hbm [shape: bf16[256,384], index: 8, kind: input, shape index: {}]   ;;  %s2229_s9 = inlined_call_operand.vmem [shape: f32[1,384], index: 9, kind: input, shape index: {}]   ;;  %s2230_s10 = inlined_call_operand.hbm [shape: bf16[16,384], index: 10, kind: output, shape index: {0}]   ;;  %s2231_s11 = inlined_call_operand.hbm [shape: f32[16,128], index: 11, kind: output, shape index: {1}]  }
   0x1   :  { %18 = vsyncpa [#allocation6], 0 }
   0x2   :  { %19 = vsyncpa [#allocation9], 0 }
   0x3   :  { %20 = vsyncpa [#allocation12], 0 }
   0x4   :  { %21 = vsyncpa [#allocation4], 0 }
   0x5   :  { %22 = vsyncpa [#allocation15], 0  ;;  %s1989_s17 = smov [#allocation5]   ;;  %s1801_s21 = scalar_lea.hbm %s2221_s1, 128 }
   0x6   :  { %s40_s18 = sshll.u32 %s1989_s17, 4  ;;  %p1802_p0 = scmp.ne.s32.totalorder %s2221_s1, %s1801_s21  ;;  %s41_s18 = int_to_ptr.vmem [resolvable:$true] %s40_s18 }
   0x7   :  { %p1805_p1 = scmp.lt.u32.totalorder %s1801_s21, %s2221_s1 }
   0x9   :  { %p1807_p2 = pnand %p1805_p1, %p1802_p0 }
   0xb   :  { %1810 = shalt.err (!%p1807_p2)
}
   0xc   :  { %s1811_s26 = scalar_lea.vmem %s41_s18, 128  ;;  %p1816_p4 = scmp.lt.s32.totalorder %s41_s18, %s41_s18 }
   0xd   :  { %p1812_p3 = scmp.ne.s32.totalorder %s41_s18, %s1811_s26  ;;  %p1817_p5 = scmp.lt.s32.totalorder %s1811_s26, %s1811_s26 }
   0xf   :  { %p1818_p6 = por %p1817_p5, %p1816_p4 }
  0x11   :  { %p1819_p7 = pnand %p1818_p6, %p1812_p3 }
  0x13   :  { %1822 = shalt.err (!%p1819_p7)
}
  0x14   :  { %s1990_s27 = smov 64   ;;  %s1991_s28 = smov 4  }
  0x15   :  { %46 = dma.hbm_to_vmem [thread:$0]  %s2221_s1, 128, %s41_s18, [#allocation6], %s1990_s27, %s1990_s27, %s1991_s28  }
  0x16   :  { %s1992_s12 = smov [#allocation8]   ;;  %s1993_s14 = smov [#allocation2]  }
  0x17   :  { %s66_s13 = sshll.u32 %s1992_s12, 4  ;;  %s28_s15 = sshll.u32 %s1993_s14, 4  ;;  %s67_s13 = int_to_ptr.vmem [resolvable:$true] %s66_s13  ;;  %s29_s15 = int_to_ptr.vmem [resolvable:$true] %s28_s15 }
  0x18   :  { %s1823_s19 = scalar_lea.hbm %s2224_s4, 2048 }
  0x19   :  { %p1824_p8 = scmp.ne.s32.totalorder %s2224_s4, %s1823_s19  ;;  %p1827_p9 = scmp.lt.u32.totalorder %s1823_s19, %s2224_s4 }
  0x1b   :  { %p1829_p10 = pnand %p1827_p9, %p1824_p8 }
  0x1d   :  { %1832 = shalt.err (!%p1829_p10)
}
  0x1e   :  { %s1833_s1 = scalar_lea.vmem %s67_s13, 2048  ;;  %p1838_p12 = scmp.lt.s32.totalorder %s67_s13, %s67_s13 }
  0x1f   :  { %p1834_p11 = scmp.ne.s32.totalorder %s67_s13, %s1833_s1  ;;  %p1839_p13 = scmp.lt.s32.totalorder %s1833_s1, %s1833_s1 }
  0x21   :  { %p1840_p0 = por %p1839_p13, %p1838_p12 }
  0x23   :  { %p1841_p1 = pnand %p1840_p0, %p1834_p11 }
  0x25   :  { %1844 = shalt.err (!%p1841_p1)
}
  0x26   :  { %72 = dma.hbm_to_vmem [thread:$0]  %s2224_s4, 2048, %s67_s13, [#allocation9], %s1990_s27, %s1990_s27, %s1991_s28  }
  0x27   :  { %s1845_s29 = scalar_lea.hbm %s2220_s0, 384 }
  0x28   :  { %p1846_p2 = scmp.ne.s32.totalorder %s2220_s0, %s1845_s29  ;;  %p1849_p3 = scmp.lt.u32.totalorder %s1845_s29, %s2220_s0 }
  0x2a   :  { %p1851_p4 = pnand %p1849_p3, %p1846_p2 }
  0x2c   :  { %1854 = shalt.err (!%p1851_p4)
}
  0x2d   :  { %s1855_s17 = scalar_lea.vmem %s29_s15, 384  ;;  %p1860_p6 = scmp.lt.s32.totalorder %s29_s15, %s29_s15 }
  0x2e   :  { %p1856_p5 = scmp.ne.s32.totalorder %s29_s15, %s1855_s17  ;;  %p1861_p7 = scmp.lt.s32.totalorder %s1855_s17, %s1855_s17 }
  0x30   :  { %p1862_p8 = por %p1861_p7, %p1860_p6 }
  0x32   :  { %p1863_p9 = pnand %p1862_p8, %p1856_p5 }
  0x34   :  { %1866 = shalt.err (!%p1863_p9)
}
  0x35   :  { %s1994_s4 = smov 192   ;;  %s1995_s27 = smov 12  }
  0x36   :  { %34 = dma.hbm_to_vmem [thread:$0]  %s2220_s0, 384, %s29_s15, [#allocation3], %s1994_s4, %s1994_s4, %s1995_s27  }
  0x37   :  { %s1996_s19 = smov [#allocation7]   ;;  %s1867_s23 = scalar_lea.hbm %s2222_s2, 6144 }
  0x38   :  { %s52_s20 = sshll.u32 %s1996_s19, 4  ;;  %p1868_p10 = scmp.ne.s32.totalorder %s2222_s2, %s1867_s23  ;;  %s53_s20 = int_to_ptr.vmem [resolvable:$true] %s52_s20 }
  0x39   :  { %p1871_p11 = scmp.lt.u32.totalorder %s1867_s23, %s2222_s2 }
  0x3b   :  { %p1873_p12 = pnand %p1871_p11, %p1868_p10 }
  0x3d   :  { %1876 = shalt.err (!%p1873_p12)
}
  0x3e   :  { %s1877_s26 = scalar_lea.vmem %s53_s20, 6144  ;;  %p1882_p0 = scmp.lt.s32.totalorder %s53_s20, %s53_s20 }
  0x3f   :  { %p1878_p13 = scmp.ne.s32.totalorder %s53_s20, %s1877_s26  ;;  %p1883_p1 = scmp.lt.s32.totalorder %s1877_s26, %s1877_s26 }
  0x41   :  { %p1884_p2 = por %p1883_p1, %p1882_p0 }
  0x43   :  { %p1885_p3 = pnand %p1884_p2, %p1878_p13 }
  0x45   :  { %1888 = shalt.err (!%p1885_p3)
}
  0x46   :  { %s1997_s0 = smov 128   ;;  %s1998_s15 = smov 8  }
  0x47   :  { %58 = dma.hbm_to_vmem [thread:$0]  %s2222_s2, 6144, %s53_s20, [#allocation6], %s1997_s0, %s1997_s0, %s1998_s15  }
  0x48   :  { %s1999_s12 = smov [#allocation10]   ;;  %s2000_s16 = smov [#allocation11]  }
  0x49   :  { %s80_s14 = sshll.u32 %s1999_s12, 4  ;;  %s94_s17 = sshll.u32 %s2000_s16, 4  ;;  %s81_s14 = int_to_ptr.vmem [resolvable:$true] %s80_s14  ;;  %s2118_s17 = int_to_ptr.vmem [resolvable:$true] %s94_s17 }
  0x4a   :  { %s1889_s19 = scalar_lea.hbm %s2226_s6, 2048 }
  0x4b   :  { %p1890_p4 = scmp.ne.s32.totalorder %s2226_s6, %s1889_s19  ;;  %p1893_p5 = scmp.lt.u32.totalorder %s1889_s19, %s2226_s6 }
  0x4d   :  { %p1895_p6 = pnand %p1893_p5, %p1890_p4 }
  0x4f   :  { %1898 = shalt.err (!%p1895_p6)
}
  0x50   :  { %s1899_s2 = scalar_lea.vmem %s81_s14, 2048  ;;  %p1904_p8 = scmp.lt.s32.totalorder %s81_s14, %s81_s14 }
  0x51   :  { %p1900_p7 = scmp.ne.s32.totalorder %s81_s14, %s1899_s2  ;;  %p1905_p9 = scmp.lt.s32.totalorder %s1899_s2, %s1899_s2 }
  0x53   :  { %p1906_p10 = por %p1905_p9, %p1904_p8 }
  0x55   :  { %p1907_p11 = pnand %p1906_p10, %p1900_p7 }
  0x57   :  { %1910 = shalt.err (!%p1907_p11)
}
  0x58   :  { %86 = dma.hbm_to_vmem [thread:$0]  %s2226_s6, 2048, %s81_s14, [#allocation9], %s1997_s0, %s1997_s0, %s1998_s15  }
  0x59   :  { %s1911_s26 = scalar_lea.hbm %s2228_s8, 6144 }
  0x5a   :  { %p1912_p12 = scmp.ne.s32.totalorder %s2228_s8, %s1911_s26  ;;  %p1915_p13 = scmp.lt.u32.totalorder %s1911_s26, %s2228_s8 }
  0x5c   :  { %p1917_p0 = pnand %p1915_p13, %p1912_p12 }
  0x5e   :  { %1920 = shalt.err (!%p1917_p0)
}
  0x5f   :  { %s1921_s28 = scalar_lea.vmem %s2118_s17, 6144  ;;  %p1926_p2 = scmp.lt.s32.totalorder %s2118_s17, %s2118_s17 }
  0x60   :  { %p1922_p1 = scmp.ne.s32.totalorder %s2118_s17, %s1921_s28  ;;  %p1927_p3 = scmp.lt.s32.totalorder %s1921_s28, %s1921_s28 }
  0x62   :  { %p1928_p4 = por %p1927_p3, %p1926_p2 }
  0x64   :  { %p1929_p5 = pnand %p1928_p4, %p1922_p1 }
  0x66   :  { %1932 = shalt.err (!%p1929_p5)
}
  0x67   :  { %100 = dma.hbm_to_vmem [thread:$0]  %s2228_s8, 6144, %s2118_s17, [#allocation12], %s1994_s4, %s1994_s4, %s1995_s27  }
  0x68   :  { %1977 = dma.done.wait [#allocation3], 384  }
  0x69   :  { %1978 = vsyncadd [#allocation3], 4294966912 }
  0x6a   :  { %1979 = dma.done.wait [#allocation6], 6272  }
  0x6b   :  { %1980 = vsyncadd [#allocation6], 4294961024 }
  0x6c   :  { %1981 = dma.done.wait [#allocation9], 4096  }
  0x6d   :  { %1982 = vsyncadd [#allocation9], 4294963200 }
  0x6e   :  { %1983 = dma.done.wait [#allocation12], 6144  }
  0x6f   :  { %1984 = vsyncadd [#allocation12], 4294961152  ;;  %v1605_v0 = vld [vmem:[#allocation7 + $0x4] ss:$8 sps:$4 sm:$0xff]   ;;  %v1607_v1 = vld [vmem:[#allocation7] ss:$8 sps:$4 sm:$0xff]  }
  0x70   :  { %442 = vmatprep.subr.bf16.mxu0 %v1605_v0  ;;  %v1608_v2 = vld [vmem:[#allocation7 + $0x14] ss:$8 sps:$4 sm:$0xff]   ;;  %v1610_v3 = vld [vmem:[#allocation7 + $0x10] ss:$8 sps:$4 sm:$0xff]   ;;  %v1611_v4 = vld [vmem:[#allocation7 + $0x24] ss:$8 sps:$4 sm:$0xff]  }
  0x71   :  { %443 = vmatpush1.bf16.msra.mxu0 %v1607_v1  ;;  %v1613_v5 = vld [vmem:[#allocation7 + $0x20] ss:$8 sps:$4 sm:$0xff]   ;;  %v1614_v6 = vld [vmem:[#allocation7 + $0x34] ss:$8 sps:$4 sm:$0xff]   ;;  %v1616_v7 = vld [vmem:[#allocation7 + $0x30] ss:$8 sps:$4 sm:$0xff]  }
  0x72   :  { %444 = vmatprep.subr.bf16.mxu0 %v1608_v2  ;;  %v1617_v8 = vld [vmem:[#allocation7 + $0x44] ss:$8 sps:$4 sm:$0xff]   ;;  %v1619_v9 = vld [vmem:[#allocation7 + $0x40] ss:$8 sps:$4 sm:$0xff]   ;;  %v1620_v10 = vld [vmem:[#allocation7 + $0x54] ss:$8 sps:$4 sm:$0xff]  }
  0x73   :  { %v1622_v11 = vld [vmem:[#allocation7 + $0x50] ss:$8 sps:$4 sm:$0xff]   ;;  %v1623_v12 = vld [vmem:[#allocation7 + $0x64] ss:$8 sps:$4 sm:$0xff]   ;;  %v1625_v14 = vld [vmem:[#allocation7 + $0x60] ss:$8 sps:$4 sm:$0xff]  }
  0x74   :  { %v1655_v13 = vld [vmem:[#allocation2 + $0x4] ss:$12 sps:$4 sm:$0xff]   ;;  %v1626_v15 = vld [vmem:[#allocation7 + $0x74] ss:$8 sps:$4 sm:$0xff]   ;;  %v1631_v18 = vld [vmem:[#allocation7 + $0x80] ss:$8 sps:$4 sm:$0xff]  }
  0x75   :  { %445 = vmatpush1.bf16.msra.mxu0 %v1610_v3  ;;  %474 = vmatprep.mubr.bf16.mxu0 %v1655_v13  ;;  %v1628_v16 = vld [vmem:[#allocation7 + $0x70] ss:$8 sps:$4 sm:$0xff]   ;;  %v1629_v17 = vld [vmem:[#allocation7 + $0x84] ss:$8 sps:$4 sm:$0xff]   ;;  %v1632_v19 = vld [vmem:[#allocation7 + $0x94] ss:$8 sps:$4 sm:$0xff]  }
  0x76   :  { %446 = vmatprep.subr.bf16.mxu0 %v1611_v4  ;;  %v1634_v20 = vld [vmem:[#allocation7 + $0x90] ss:$8 sps:$4 sm:$0xff]   ;;  %v1635_v21 = vld [vmem:[#allocation7 + $0xa4] ss:$8 sps:$4 sm:$0xff]   ;;  %v1637_v24 = vld [vmem:[#allocation7 + $0xa0] ss:$8 sps:$4 sm:$0xff]  }
  0x77   :  { %v1681_v22 = vld [vmem:[#allocation8 + $0x40] sm:$0xff]   ;;  %v1683_v25 = vld [vmem:[#allocation8 + $0x48] sm:$0xff]   ;;  %v1685_v27 = vld [vmem:[#allocation8 + $0x50] sm:$0xff]   ;;  %v2001_v50 = vmov 0  }
  0x78   :  { %v1682_v23 = vld [vmem:[#allocation8] sm:$0xff]   ;;  %1538 = vmatprep.subr.bf16.mxu1 %v1681_v22  ;;  %v1684_v26 = vld [vmem:[#allocation8 + $0x8] sm:$0xff]   ;;  %v1638_v28 = vld [vmem:[#allocation7 + $0xb4] ss:$8 sps:$4 sm:$0xff]  }
  0x79   :  { %447 = vmatpush1.bf16.msra.mxu0 %v1613_v5  ;;  %1539 = vmatpush3.bf16.msra.mxu1 %v1682_v23  ;;  %v1640_v29 = vld [vmem:[#allocation7 + $0xb0] ss:$8 sps:$4 sm:$0xff]   ;;  %v1641_v32 = vld [vmem:[#allocation7 + $0xc4] ss:$8 sps:$4 sm:$0xff]   ;;  %v1643_v33 = vld [vmem:[#allocation7 + $0xc0] ss:$8 sps:$4 sm:$0xff]   ;;  %v176_v5 = vlaneseq }
  0x7a   :  { %448 = vmatprep.subr.bf16.mxu0 %v1614_v6  ;;  %1540 = vmatprep.subr.bf16.mxu1 %v1683_v25  ;;  %v1686_v30 = vld [vmem:[#allocation8 + $0x10] sm:$0xff]   ;;  %v1687_v31 = vld [vmem:[#allocation8 + $0x58] sm:$0xff]   ;;  %v1689_v35 = vld [vmem:[#allocation8 + $0x60] sm:$0xff]  }
  0x7b   :  { %v1688_v34 = vld [vmem:[#allocation8 + $0x18] sm:$0xff]   ;;  %v1690_v37 = vld [vmem:[#allocation8 + $0x20] sm:$0xff]   ;;  %v1691_v39 = vld [vmem:[#allocation8 + $0x68] sm:$0xff]   ;;  %v2157_v6 = vshrl.u32 %v176_v5, 7 }
  0x7c   :  { %v1644_v36 = vld [vmem:[#allocation7 + $0xd4] ss:$8 sps:$4 sm:$0xff]   ;;  %v1646_v38 = vld [vmem:[#allocation7 + $0xd0] ss:$8 sps:$4 sm:$0xff]   ;;  %v1647_v40 = vld [vmem:[#allocation7 + $0xe4] ss:$8 sps:$4 sm:$0xff]  }
  0x7d   :  { %449 = vmatpush1.bf16.msra.mxu0 %v1616_v7  ;;  %1541 = vmatpush3.bf16.msra.mxu1 %v1684_v26  ;;  %v1649_v41 = vld [vmem:[#allocation7 + $0xe0] ss:$8 sps:$4 sm:$0xff]   ;;  %v1650_v42 = vld [vmem:[#allocation7 + $0xf4] ss:$8 sps:$4 sm:$0xff]   ;;  %v1652_v43 = vld [vmem:[#allocation7 + $0xf0] ss:$8 sps:$4 sm:$0xff]  }
  0x7e   :  { %450 = vmatprep.subr.bf16.mxu0 %v1617_v8  ;;  %1542 = vmatprep.subr.bf16.mxu1 %v1685_v27  ;;  %v1658_v44 = vld [vmem:[#allocation7 + $0x104] ss:$8 sps:$4 sm:$0xff]   ;;  %v1656_v46 = vld [vmem:[#allocation7 + $0x100] ss:$8 sps:$4 sm:$0xff]   ;;  %v1661_v47 = vld [vmem:[#allocation7 + $0x114] ss:$8 sps:$4 sm:$0xff]  }
  0x7f   :  { %v1653_v45 = vld [vmem:[#allocation2] ss:$12 sps:$4 sm:$0xff]   ;;  %v1659_v48 = vld [vmem:[#allocation7 + $0x110] ss:$8 sps:$4 sm:$0xff]   ;;  %v1667_v52 = vld [vmem:[#allocation7 + $0x134] ss:$8 sps:$4 sm:$0xff]  }
  0x80   :  { %v1664_v49 = vld [vmem:[#allocation7 + $0x124] ss:$8 sps:$4 sm:$0xff]   ;;  %v1662_v51 = vld [vmem:[#allocation7 + $0x120] ss:$8 sps:$4 sm:$0xff]   ;;  %v1665_v53 = vld [vmem:[#allocation7 + $0x130] ss:$8 sps:$4 sm:$0xff]  }
  0x81   :  { %451 = vmatpush1.bf16.msra.mxu0 %v1619_v9  ;;  %1543 = vmatpush3.bf16.msra.mxu1 %v1686_v30  ;;  %v1670_v54 = vld [vmem:[#allocation7 + $0x144] ss:$8 sps:$4 sm:$0xff]   ;;  %v1668_v55 = vld [vmem:[#allocation7 + $0x140] ss:$8 sps:$4 sm:$0xff]   ;;  %v1673_v56 = vld [vmem:[#allocation7 + $0x154] ss:$8 sps:$4 sm:$0xff]  }
  0x82   :  { %452 = vmatprep.subr.bf16.mxu0 %v1620_v10  ;;  %1544 = vmatprep.subr.bf16.mxu1 %v1687_v31  ;;  %v1671_v57 = vld [vmem:[#allocation7 + $0x150] ss:$8 sps:$4 sm:$0xff]   ;;  %v1676_v58 = vld [vmem:[#allocation7 + $0x164] ss:$8 sps:$4 sm:$0xff]   ;;  %v1674_v59 = vld [vmem:[#allocation7 + $0x160] ss:$8 sps:$4 sm:$0xff]  }
  0x83   :  { %v1679_v60 = vld [vmem:[#allocation7 + $0x174] ss:$8 sps:$4 sm:$0xff]   ;;  %v1677_v61 = vld [vmem:[#allocation7 + $0x170] ss:$8 sps:$4 sm:$0xff]   ;;  %v1692_v63 = vld [vmem:[#allocation8 + $0x28] sm:$0xff]   ;;  %v2160_v7 = vsub.s32 0, %v2157_v6 }
  0x84   :  { %v1680_v62 = vld [vmem:[#allocation2 + $0x8] ss:$12 sps:$4 sm:$0xff]   ;;  %v1695_v2 = vld [vmem:[#allocation8 + $0x78] sm:$0xff]   ;;  %v1699_v4 = vld [vmem:[#allocation10 + $0x4] ss:$8 sps:$4 sm:$0xff]   ;;  %v2166_v9 = vsub.s32 1, %v2157_v6 }
  0x85   :  { %453 = vmatpush1.bf16.msra.mxu0 %v1622_v11  ;;  %1545 = vmatpush3.bf16.msra.mxu1 %v1688_v34  ;;  %v1693_v0 = vld [vmem:[#allocation8 + $0x70] sm:$0xff]   ;;  %v1696_v3 = vld [vmem:[#allocation8 + $0x38] sm:$0xff]   ;;  %v174_v8 = vld [vmem:[%s2223_s3] sm:$0x3] }
  0x86   :  { %454 = vmatprep.subr.bf16.mxu0 %v1623_v12  ;;  %1546 = vmatprep.subr.bf16.mxu1 %v1689_v35  ;;  %v1694_v1 = vld [vmem:[#allocation8 + $0x30] sm:$0xff]   ;;  %v179_v10 = vrot.slane %v174_v8, %v2160_v7  ;;  %v183_v11 = vrot.slane %v174_v8, %v2166_v9  ;;  %v1697_v26 = vld [vmem:[#allocation10] ss:$8 sps:$4 sm:$0xff]  }
  0x87   :  { %v1702_v27 = vld [vmem:[#allocation10 + $0x14] ss:$8 sps:$4 sm:$0xff]   ;;  %v1703_v30 = vld [vmem:[#allocation10 + $0x20] ss:$8 sps:$4 sm:$0xff]  }
  0x88   :  { %v1708_v31 = vld [vmem:[#allocation10 + $0x34] ss:$8 sps:$4 sm:$0xff]   ;;  %v1709_v34 = vld [vmem:[#allocation10 + $0x40] ss:$8 sps:$4 sm:$0xff]  }
  0x89   :  { %455 = vmatpush1.bf16.msra.mxu0 %v1625_v14  ;;  %1547 = vmatpush3.bf16.msra.mxu1 %v1690_v37  ;;  %v1714_v35 = vld [vmem:[#allocation10 + $0x54] ss:$8 sps:$4 sm:$0xff]   ;;  %v1717_v37 = vld [vmem:[#allocation10 + $0x64] ss:$8 sps:$4 sm:$0xff]  }
  0x8a   :  { %456 = vmatprep.subr.bf16.mxu0 %v1626_v15  ;;  %1548 = vmatprep.subr.bf16.mxu1 %v1691_v39  ;;  %v1720_v39 = vld [vmem:[#allocation10 + $0x74] ss:$8 sps:$4 sm:$0xff]  }
  0x8d   :  { %457 = vmatpush1.bf16.msra.mxu0 %v1628_v16  ;;  %1549 = vmatpush3.bf16.msra.mxu1 %v1692_v63 }
  0x8e   :  { %458 = vmatprep.subr.bf16.mxu0 %v1629_v17  ;;  %1550 = vmatprep.subr.bf16.mxu1 %v1693_v0 }
  0x91   :  { %459 = vmatpush1.bf16.msra.mxu0 %v1631_v18  ;;  %1551 = vmatpush3.bf16.msra.mxu1 %v1694_v1 }
  0x92   :  { %460 = vmatprep.subr.bf16.mxu0 %v1632_v19  ;;  %1552 = vmatprep.subr.bf16.mxu1 %v1695_v2 }
  0x95   :  { %461 = vmatpush1.bf16.msra.mxu0 %v1634_v20  ;;  %1553 = vmatpush3.bf16.msra.mxu1 %v1696_v3 }
  0x96   :  { %462 = vmatprep.subr.bf16.mxu0 %v1635_v21  ;;  %840 = vmatprep.subr.bf16.mxu1 %v1699_v4 }
  0x99   :  { %463 = vmatpush1.bf16.msra.mxu0 %v1637_v24 }
  0x9a   :  { %464 = vmatprep.subr.bf16.mxu0 %v1638_v28  ;;  %v1700_v28 = vld [vmem:[#allocation10 + $0x10] ss:$8 sps:$4 sm:$0xff]  }
  0x9d   :  { %465 = vmatpush1.bf16.msra.mxu0 %v1640_v29  ;;  %v1705_v29 = vld [vmem:[#allocation10 + $0x24] ss:$8 sps:$4 sm:$0xff]  }
  0x9e   :  { %466 = vmatprep.subr.bf16.mxu0 %v1641_v32  ;;  %v1706_v32 = vld [vmem:[#allocation10 + $0x30] ss:$8 sps:$4 sm:$0xff]  }
  0xa1   :  { %467 = vmatpush1.bf16.msra.mxu0 %v1643_v33  ;;  %v1711_v33 = vld [vmem:[#allocation10 + $0x44] ss:$8 sps:$4 sm:$0xff]  }
  0xa2   :  { %468 = vmatprep.subr.bf16.mxu0 %v1644_v36  ;;  %v1712_v36 = vld [vmem:[#allocation10 + $0x50] ss:$8 sps:$4 sm:$0xff]  }
  0xa5   :  { %469 = vmatpush1.bf16.msra.mxu0 %v1646_v38  ;;  %v1715_v38 = vld [vmem:[#allocation10 + $0x60] ss:$8 sps:$4 sm:$0xff]  }
  0xa6   :  { %470 = vmatprep.subr.bf16.mxu0 %v1647_v40  ;;  %v1718_v40 = vld [vmem:[#allocation10 + $0x70] ss:$8 sps:$4 sm:$0xff]  }
  0xa9   :  { %471 = vmatpush1.bf16.msra.mxu0 %v1649_v41  ;;  %v1723_v41 = vld [vmem:[#allocation11 + $0x4] ss:$12 sps:$4 sm:$0xff]  }
  0xaa   :  { %472 = vmatprep.subr.bf16.mxu0 %v1650_v42  ;;  %v1748_v42 = vld [vmem:[#allocation11 + $0xc8] ss:$12 sps:$4 sm:$0xff]  }
  0xad   :  { %473 = vmatpush1.bf16.msra.mxu0 %v1652_v43  ;;  %v1749_v43 = vld [vmem:[#allocation11 + $0x8] ss:$12 sps:$4 sm:$0xff]  }
  0xae   :  { %485 = vmatprep.subr.bf16.mxu0 %v1658_v44  ;;  %v1753_v44 = vld [vmem:[#allocation11 + $0xe0] ss:$12 sps:$4 sm:$0xff]  }
  0xb0   :  { %475 = vmatmul.mubr.bf16.vlgmr.msra.gmra.mrb[0].mxu0 %v1653_v45  ;;  %v1754_v45 = vld [vmem:[#allocation11 + $0x20] ss:$12 sps:$4 sm:$0xff]  }
  0xb1   :  { %486 = vmatpush1.bf16.msra.mxu0 %v1656_v46  ;;  %517 = vmatprep.mubr.bf16.mxu0 %v2001_v50  ;;  %v1758_v46 = vld [vmem:[#allocation11 + $0xf8] ss:$12 sps:$4 sm:$0xff]  }
  0xb2   :  { %487 = vmatprep.subr.bf16.mxu0 %v1661_v47  ;;  %v1759_v47 = vld [vmem:[#allocation11 + $0x38] ss:$12 sps:$4 sm:$0xff]  }
  0xb5   :  { %488 = vmatpush1.bf16.msra.mxu0 %v1659_v48  ;;  %v1763_v48 = vld [vmem:[#allocation11 + $0x110] ss:$12 sps:$4 sm:$0xff]  }
  0xb6   :  { %489 = vmatprep.subr.bf16.mxu0 %v1664_v49  ;;  %v1764_v49 = vld [vmem:[#allocation11 + $0x50] ss:$12 sps:$4 sm:$0xff]  }
  0xb9   :  { %490 = vmatpush1.bf16.msra.mxu0 %v1662_v51  ;;  %v1769_v51 = vld [vmem:[#allocation11 + $0x68] ss:$12 sps:$4 sm:$0xff]  }
  0xba   :  { %491 = vmatprep.subr.bf16.mxu0 %v1667_v52  ;;  %v1773_v52 = vld [vmem:[#allocation11 + $0x140] ss:$12 sps:$4 sm:$0xff]  }
  0xbd   :  { %492 = vmatpush1.bf16.msra.mxu0 %v1665_v53 }
  0xbe   :  { %493 = vmatprep.subr.bf16.mxu0 %v1670_v54  ;;  %v1445_v54 = vld [vmem:[%s2225_s5] ss:$0 sm:$0xff] }
  0xc1   :  { %494 = vmatpush1.bf16.msra.mxu0 %v1668_v55 }
  0xc2   :  { %495 = vmatprep.subr.bf16.mxu0 %v1673_v56  ;;  %v713_v56 = vand.u32 127, %v176_v5  ;;  %v1535_v5 = vld [vmem:[#allocation5] sm:$0xff]  }
  0xc3   :  { %v1536_v8 = vunpack.c.l.bf16 %v1535_v5 }
  0xc4   :  { %vm714_vm0 = vcmp.lt.s32.totalorder %v713_v56, 64 }
  0xc5   :  { %496 = vmatpush1.bf16.msra.mxu0 %v1671_v57 }
  0xc6   :  { %497 = vmatprep.subr.bf16.mxu0 %v1676_v58 }
  0xc9   :  { %498 = vmatpush1.bf16.msra.mxu0 %v1674_v59 }
  0xca   :  { %499 = vmatprep.subr.bf16.mxu0 %v1679_v60 }
  0xcd   :  { %500 = vmatpush1.bf16.msra.mxu0 %v1677_v61 }
  0xce   :  { %1560 = vmatprep.subr.bf16.mxu0 %v1748_v42  ;;  %v1765_v42 = vld [vmem:[#allocation11 + $0x120] ss:$12 sps:$4 sm:$0xff]  }
  0xd0   :  { %518 = vmatmul.mubr.bf16.vlgmr.msra.gmra.mrb[0].mxu0 %v1680_v62 }
  0xd1   :  { %1561 = vmatpush3.bf16.msra.mxu0 %v1749_v43  ;;  %v1772_v43 = vld [vmem:[#allocation11 + $0x13c] ss:$12 sps:$4 sm:$0xff]  }
  0xd2   :  { %1562 = vmatprep.subr.bf16.mxu0 %v1753_v44  ;;  %v1770_v44 = vld [vmem:[#allocation11 + $0x138] ss:$12 sps:$4 sm:$0xff]  }
  0xd5   :  { %1563 = vmatpush3.bf16.msra.mxu0 %v1754_v45  ;;  %v1774_v45 = vld [vmem:[#allocation11 + $0x80] ss:$12 sps:$4 sm:$0xff]  }
  0xd6   :  { %1564 = vmatprep.subr.bf16.mxu0 %v1758_v46  ;;  %v1777_v46 = vld [vmem:[#allocation11 + $0x154] ss:$12 sps:$4 sm:$0xff]  }
  0xd9   :  { %1565 = vmatpush3.bf16.msra.mxu0 %v1759_v47  ;;  %v1778_v47 = vld [vmem:[#allocation11 + $0x158] ss:$12 sps:$4 sm:$0xff]  }
  0xda   :  { %1566 = vmatprep.subr.bf16.mxu0 %v1763_v48  ;;  %v1775_v48 = vld [vmem:[#allocation11 + $0x150] ss:$12 sps:$4 sm:$0xff]  }
  0xdd   :  { %1567 = vmatpush3.bf16.msra.mxu0 %v1764_v49  ;;  %v1779_v49 = vld [vmem:[#allocation11 + $0x98] ss:$12 sps:$4 sm:$0xff]  }
 0x1a3   :  { %v519_v12 = vpop.f32.mrb[0].mxu0 }
 0x1a4   :  { %v1582_v13 = vadd.f32 %v519_v12, %v179_v10  ;;  %v521_v14 = vpop.f32.mrb[1].mxu0 }
 0x1a5   :  { %v1583_v15 = vadd.f32 %v521_v14, %v183_v11  ;;  %v523_v16 = vpop.f32.mrb[2].mxu0 }
 0x1a6   :  { %v1584_v17 = vadd.f32 %v523_v16, %v179_v10  ;;  %v525_v18 = vpop.f32.mrb[3].mxu0  ;;  %v528_v20 = vmax.f32 %v1582_v13, 0.0  ;;  %v1537_v10 = vunpack.c.h.bf16 %v1535_v5 }
 0x1a7   :  { %v1585_v19 = vadd.f32 %v525_v18, %v183_v11  ;;  %v529_v22 = vmax.f32 %v1583_v15, 0.0 }
 0x1a8   :  { %v530_v21 = vmax.f32 %v1584_v17, 0.0  ;;  %v1721_v17 = vld [vmem:[#allocation11] ss:$12 sps:$4 sm:$0xff]  }
 0x1a9   :  { %v531_v23 = vmax.f32 %v1585_v19, 0.0  ;;  %v1726_v19 = vld [vmem:[#allocation11 + $0x1c] ss:$12 sps:$4 sm:$0xff]  }
 0x1aa   :  { %v532_v24 = vpack.c.bf16 %v530_v21, %v528_v20  ;;  %v1724_v20 = vld [vmem:[#allocation11 + $0x18] ss:$12 sps:$4 sm:$0xff]   ;;  %v1729_v21 = vld [vmem:[#allocation11 + $0x34] ss:$12 sps:$4 sm:$0xff]  }
 0x1ab   :  { %v533_v25 = vpack.c.bf16 %v531_v23, %v529_v22  ;;  %v1727_v22 = vld [vmem:[#allocation11 + $0x30] ss:$12 sps:$4 sm:$0xff]   ;;  %v1732_v23 = vld [vmem:[#allocation11 + $0x4c] ss:$12 sps:$4 sm:$0xff]  }
 0x1ad   :  { %701 = vmatprep.mubr.bf16.mxu1 %v533_v25  ;;  %v1735_v25 = vld [vmem:[#allocation11 + $0x64] ss:$12 sps:$4 sm:$0xff]  }
 0x1ae   :  { %702 = vmatmul.mubr.bf16.vlgmr.msra.gmra.mrb[0].mxu1 %v532_v24  ;;  %v1730_v24 = vld [vmem:[#allocation11 + $0x48] ss:$12 sps:$4 sm:$0xff]  }
 0x1af   :  { %841 = vmatpush1.bf16.msra.mxu1 %v1697_v26  ;;  %872 = vmatprep.mubr.bf16.mxu1 %v2001_v50  ;;  %v1768_v50 = vld [vmem:[#allocation11 + $0x128] ss:$12 sps:$4 sm:$0xff]   ;;  %v1733_v26 = vld [vmem:[#allocation11 + $0x60] ss:$12 sps:$4 sm:$0xff]  }
 0x1b0   :  { %842 = vmatprep.subr.bf16.mxu1 %v1702_v27  ;;  %1568 = vmatprep.subr.bf16.mxu0 %v1768_v50  ;;  %v1738_v27 = vld [vmem:[#allocation11 + $0x7c] ss:$12 sps:$4 sm:$0xff]   ;;  %v1782_v50 = vld [vmem:[#allocation11 + $0x16c] ss:$12 sps:$4 sm:$0xff]  }
 0x1b1   :  { %1569 = vmatpush3.bf16.msra.mxu0 %v1769_v51  ;;  %v1783_v51 = vld [vmem:[#allocation11 + $0x170] ss:$12 sps:$4 sm:$0xff]  }
 0x1b2   :  { %1570 = vmatprep.subr.bf16.mxu0 %v1773_v52  ;;  %v1780_v52 = vld [vmem:[#allocation11 + $0x168] ss:$12 sps:$4 sm:$0xff]  }
 0x1b3   :  { %843 = vmatpush1.bf16.msra.mxu1 %v1700_v28  ;;  %v1736_v28 = vld [vmem:[#allocation11 + $0x78] ss:$12 sps:$4 sm:$0xff]  }
 0x1b4   :  { %844 = vmatprep.subr.bf16.mxu1 %v1705_v29  ;;  %v1741_v29 = vld [vmem:[#allocation11 + $0x94] ss:$12 sps:$4 sm:$0xff]  }
 0x1b5   :  { %1571 = vmatpush3.bf16.msra.mxu0 %v1774_v45 }
 0x1b6   :  { %1572 = vmatprep.subr.bf16.mxu0 %v1778_v47 }
 0x1b7   :  { %845 = vmatpush1.bf16.msra.mxu1 %v1703_v30  ;;  %v1739_v30 = vld [vmem:[#allocation11 + $0x90] ss:$12 sps:$4 sm:$0xff]  }
 0x1b8   :  { %846 = vmatprep.subr.bf16.mxu1 %v1708_v31  ;;  %v1744_v31 = vld [vmem:[#allocation11 + $0xac] ss:$12 sps:$4 sm:$0xff]  }
 0x1b9   :  { %1573 = vmatpush3.bf16.msra.mxu0 %v1779_v49 }
 0x1ba   :  { %1574 = vmatprep.subr.bf16.mxu0 %v1783_v51 }
 0x1bb   :  { %847 = vmatpush1.bf16.msra.mxu1 %v1706_v32  ;;  %v1742_v32 = vld [vmem:[#allocation11 + $0xa8] ss:$12 sps:$4 sm:$0xff]  }
 0x1bc   :  { %848 = vmatprep.subr.bf16.mxu1 %v1711_v33  ;;  %v1747_v33 = vld [vmem:[#allocation11 + $0xc4] ss:$12 sps:$4 sm:$0xff]  }
 0x1bf   :  { %849 = vmatpush1.bf16.msra.mxu1 %v1709_v34  ;;  %v1745_v34 = vld [vmem:[#allocation11 + $0xc0] ss:$12 sps:$4 sm:$0xff]  }
 0x1c0   :  { %850 = vmatprep.subr.bf16.mxu1 %v1714_v35  ;;  %v1752_v35 = vld [vmem:[#allocation11 + $0xdc] ss:$12 sps:$4 sm:$0xff]  }
 0x1c3   :  { %851 = vmatpush1.bf16.msra.mxu1 %v1712_v36  ;;  %v1750_v36 = vld [vmem:[#allocation11 + $0xd8] ss:$12 sps:$4 sm:$0xff]  }
 0x1c4   :  { %852 = vmatprep.subr.bf16.mxu1 %v1717_v37  ;;  %v1757_v37 = vld [vmem:[#allocation11 + $0xf4] ss:$12 sps:$4 sm:$0xff]  }
 0x1c7   :  { %853 = vmatpush1.bf16.msra.mxu1 %v1715_v38  ;;  %v1755_v38 = vld [vmem:[#allocation11 + $0xf0] ss:$12 sps:$4 sm:$0xff]  }
 0x1c8   :  { %854 = vmatprep.subr.bf16.mxu1 %v1720_v39  ;;  %v1762_v39 = vld [vmem:[#allocation11 + $0x10c] ss:$12 sps:$4 sm:$0xff]  }
 0x1cb   :  { %855 = vmatpush1.bf16.msra.mxu1 %v1718_v40  ;;  %v1760_v40 = vld [vmem:[#allocation11 + $0x108] ss:$12 sps:$4 sm:$0xff]  }
 0x1cc   :  { %1226 = vmatprep.subr.bf16.mxu1 %v1723_v41  ;;  %v1767_v41 = vld [vmem:[#allocation11 + $0x124] ss:$12 sps:$4 sm:$0xff]  }
 0x281   :  { %v1554_v53 = vpop.f32.mrb[0].mxu1 }
 0x282   :  { %v1555_v55 = vpop.f32.mrb[1].mxu1 }
 0x283   :  { %v1556_v57 = vadd.f32 %v1555_v55, %v1554_v53  ;;  %v1557_v58 = vpop.f32.mrb[2].mxu1  ;;  %v1784_v53 = vld [vmem:[#allocation11 + $0xb0] ss:$12 sps:$4 sm:$0xff]  }
 0x284   :  { %v1558_v59 = vpop.f32.mrb[3].mxu1  ;;  %1575 = vmatpush3.bf16.msra.mxu0 %v1784_v53 }
 0x285   :  { %v704_v60 = vadd.f32 %v1556_v57, %v1445_v54  ;;  %v1559_v61 = vadd.f32 %v1558_v59, %v1557_v58 }
 0x287   :  { %v715_v62 = vmul.f32 0.5, %v704_v60  ;;  %710 = vst [vmem:[#allocation14] sm:$0xff] %v704_v60  ;;  %v707_v63 = vadd.f32 %v1559_v61, %v1445_v54  ;;  %v748_v54 = vld [vmem:[%s2227_s7] sm:$0x3]  ;;  %s2002_s7 = smov [#allocation14]  }
 0x288   :  { %v753_v55 = vrot.slane %v748_v54, %v2160_v7  ;;  %v757_v56 = vrot.slane %v748_v54, %v2166_v9  ;;  %s1375_s21 = sshll.u32 %s2002_s7, 4  ;;  %s1376_s21 = int_to_ptr.vmem [resolvable:$true] %s1375_s21 }
 0x289   :  { %v717_v0 = vsel %vm714_vm0, 0.0, %v715_v62  ;;  %v716_v1 = vmul.f32 0.5, %v707_v63  ;;  %711 = vst [vmem:[#allocation14 + $0x8] sm:$0xff] %v707_v63  ;;  %s1933_s22 = scalar_lea.vmem %s1376_s21, 256  ;;  %p1938_p7 = scmp.lt.s32.totalorder %s1376_s21, %s1376_s21 }
 0x28a   :  { %v719_v2 = vmul.f32 1.442695, %v717_v0  ;;  %p1934_p6 = scmp.ne.s32.totalorder %s1376_s21, %s1933_s22  ;;  %p1939_p8 = scmp.lt.s32.totalorder %s1933_s22, %s1933_s22 }
 0x28b   :  { %v718_v3 = vsel %vm714_vm0, 0.0, %v716_v1 }
 0x28c   :  { %1785 = vpow2.f32 %v719_v2  ;;  %v721_v4 = vmul.f32 1.442695, %v718_v3  ;;  %p1940_p9 = por %p1939_p8, %p1938_p7 }
 0x28e   :  { %1787 = vpow2.f32 %v721_v4  ;;  %p1941_p10 = pnand %p1940_p9, %p1934_p6 }
 0x296   :  { %v1786_v11 = vpop.eup %1785 }
 0x297   :  { %v727_v12 = vmul.f32 %v1786_v11, %v1536_v8 }
 0x298   :  { %v1788_v13 = vpop.eup %1787 }
 0x299   :  { %v728_v14 = vmul.f32 %v1788_v13, %v1537_v10  ;;  %v729_v15 = vsel %vm714_vm0, %v704_v60, %v727_v12 }
 0x29b   :  { %v730_v16 = vsel %vm714_vm0, %v707_v63, %v728_v14 }
 0x29c   :  { %v731_v18 = vpack.c.bf16 %v730_v16, %v729_v15 }
 0x29e   :  { %873 = vmatmul.mubr.bf16.vlgmr.msra.gmra.mrb[4].mxu1 %v731_v18 }
 0x29f   :  { %1227 = vmatpush1.bf16.msra.mxu1 %v1721_v17 }
 0x2a0   :  { %1228 = vmatprep.subr.bf16.mxu1 %v1726_v19 }
 0x2a3   :  { %1229 = vmatpush1.bf16.msra.mxu1 %v1724_v20 }
 0x2a4   :  { %1230 = vmatprep.subr.bf16.mxu1 %v1729_v21 }
 0x2a7   :  { %1231 = vmatpush1.bf16.msra.mxu1 %v1727_v22 }
 0x2a8   :  { %1232 = vmatprep.subr.bf16.mxu1 %v1732_v23 }
 0x2ab   :  { %1233 = vmatpush1.bf16.msra.mxu1 %v1730_v24 }
 0x2ac   :  { %1234 = vmatprep.subr.bf16.mxu1 %v1735_v25 }
 0x2af   :  { %1235 = vmatpush1.bf16.msra.mxu1 %v1733_v26 }
 0x2b0   :  { %1236 = vmatprep.subr.bf16.mxu1 %v1738_v27 }
 0x2b3   :  { %1237 = vmatpush1.bf16.msra.mxu1 %v1736_v28 }
 0x2b4   :  { %1238 = vmatprep.subr.bf16.mxu1 %v1741_v29 }
 0x2b7   :  { %1239 = vmatpush1.bf16.msra.mxu1 %v1739_v30 }
 0x2b8   :  { %1240 = vmatprep.subr.bf16.mxu1 %v1744_v31 }
 0x2bb   :  { %1241 = vmatpush1.bf16.msra.mxu1 %v1742_v32 }
 0x2bc   :  { %1242 = vmatprep.subr.bf16.mxu1 %v1747_v33 }
 0x2bf   :  { %1243 = vmatpush1.bf16.msra.mxu1 %v1745_v34 }
 0x2c0   :  { %1244 = vmatprep.subr.bf16.mxu1 %v1752_v35 }
 0x2c3   :  { %1245 = vmatpush1.bf16.msra.mxu1 %v1750_v36 }
 0x2c4   :  { %1246 = vmatprep.subr.bf16.mxu1 %v1757_v37 }
 0x2c7   :  { %1247 = vmatpush1.bf16.msra.mxu1 %v1755_v38 }
 0x2c8   :  { %1248 = vmatprep.subr.bf16.mxu1 %v1762_v39 }
 0x2cb   :  { %1249 = vmatpush1.bf16.msra.mxu1 %v1760_v40 }
 0x2cc   :  { %1250 = vmatprep.subr.bf16.mxu1 %v1767_v41 }
 0x2cf   :  { %1251 = vmatpush1.bf16.msra.mxu1 %v1765_v42 }
 0x2d0   :  { %1252 = vmatprep.subr.bf16.mxu1 %v1772_v43 }
 0x2d3   :  { %1253 = vmatpush1.bf16.msra.mxu1 %v1770_v44 }
 0x2d4   :  { %1254 = vmatprep.subr.bf16.mxu1 %v1777_v46 }
 0x2d7   :  { %1255 = vmatpush1.bf16.msra.mxu1 %v1775_v48 }
 0x2d8   :  { %1256 = vmatprep.subr.bf16.mxu1 %v1782_v50 }
 0x2db   :  { %1257 = vmatpush1.bf16.msra.mxu1 %v1780_v52 }
 0x371   :  { %v874_v57 = vpop.f32.mrb[4].mxu1 }
 0x372   :  { %v875_v58 = vadd.f32 %v874_v57, %v753_v55  ;;  %v876_v59 = vpop.f32.mrb[5].mxu1 }
 0x373   :  { %v877_v60 = vadd.f32 %v876_v59, %v757_v56  ;;  %v878_v61 = vpop.f32.mrb[6].mxu1 }
 0x374   :  { %v879_v62 = vadd.f32 %v878_v61, %v753_v55  ;;  %v880_v63 = vpop.f32.mrb[7].mxu1  ;;  %v883_v1 = vmax.f32 %v875_v58, 0.0 }
 0x375   :  { %v881_v0 = vadd.f32 %v880_v63, %v757_v56  ;;  %v884_v3 = vmax.f32 %v877_v60, 0.0 }
 0x376   :  { %v885_v2 = vmax.f32 %v879_v62, 0.0 }
 0x377   :  { %v886_v4 = vmax.f32 %v881_v0, 0.0 }
 0x378   :  { %v887_v5 = vpack.c.bf16 %v885_v2, %v883_v1 }
 0x379   :  { %v888_v8 = vpack.c.bf16 %v886_v4, %v884_v3 }
 0x37b   :  { %1258 = vmatprep.mubr.bf16.mxu1 %v888_v8  ;;  %1301 = vmatprep.mubr.bf16.mxu0 %v888_v8 }
 0x37c   :  { %1259 = vmatmul.mubr.bf16.vlgmr.msra.gmra.mrb[8].mxu1 %v887_v5  ;;  %1302 = vmatmul.mubr.bf16.vlgmr.msra.gmra.mrb[4].mxu0 %v887_v5 }
 0x37d   :  { %1944 = shalt.err (!%p1941_p10)
}
 0x37e   :  { %s1945_s2 = scalar_lea.hbm %s2231_s11, 256 }
 0x37f   :  { %p1946_p11 = scmp.ne.s32.totalorder %s2231_s11, %s1945_s2  ;;  %p1949_p12 = scmp.lt.u32.totalorder %s1945_s2, %s2231_s11 }
 0x381   :  { %p1951_p13 = pnand %p1949_p12, %p1946_p11 }
 0x383   :  { %1954 = shalt.err (!%p1951_p13)
}
 0x384   :  { %1381 = dma.vmem_to_hbm [thread:$0]  %s1376_s21, 256, %s2231_s11, [#allocation15], %s1997_s0, %s1997_s0, %s1998_s15   ;;  %v965_v11 = vsub.s32 2, %v2157_v6 }
 0x385   :  { %v953_v10 = vld [vmem:[%s2229_s9] sm:$0x7]  ;;  %s2003_s9 = smov [#allocation13]  }
 0x386   :  { %v958_v12 = vrot.slane %v953_v10, %v2160_v7  ;;  %v962_v13 = vrot.slane %v953_v10, %v2166_v9  ;;  %v966_v16 = vrot.slane %v953_v10, %v965_v11  ;;  %s1363_s11 = sshll.u32 %s2003_s9, 4  ;;  %s1364_s11 = int_to_ptr.vmem [resolvable:$true] %s1363_s11 }
 0x387   :  { %s1955_s0 = scalar_lea.vmem %s1364_s11, 384  ;;  %p1960_p1 = scmp.lt.s32.totalorder %s1364_s11, %s1364_s11 }
 0x388   :  { %p1956_p0 = scmp.ne.s32.totalorder %s1364_s11, %s1955_s0  ;;  %p1961_p2 = scmp.lt.s32.totalorder %s1955_s0, %s1955_s0 }
 0x38a   :  { %p1962_p3 = por %p1961_p2, %p1960_p1 }
 0x38c   :  { %p1963_p4 = pnand %p1962_p3, %p1956_p0 }
 0x44f   :  { %v1260_v14 = vpop.f32.mrb[8].mxu1  ;;  %v1576_v15 = vpop.f32.mrb[4].mxu0 }
 0x450   :  { %v1261_v17 = vadd.f32 %v1260_v14, %v958_v12  ;;  %v1262_v18 = vpop.f32.mrb[9].mxu1  ;;  %v1577_v19 = vpop.f32.mrb[5].mxu0 }
 0x451   :  { %v1263_v20 = vadd.f32 %v1262_v18, %v962_v13  ;;  %v1578_v21 = vadd.f32 %v1577_v19, %v1576_v15  ;;  %v1264_v22 = vpop.f32.mrb[10].mxu1  ;;  %v1579_v23 = vpop.f32.mrb[6].mxu0 }
 0x452   :  { %v1310_v24 = vmul.f32 0.5, %v1261_v17  ;;  %v1265_v25 = vadd.f32 %v1264_v22, %v958_v12  ;;  %v1266_v26 = vpop.f32.mrb[11].mxu1  ;;  %v1580_v27 = vpop.f32.mrb[7].mxu0 }
 0x453   :  { %v1311_v28 = vmul.f32 0.5, %v1263_v20  ;;  %v1304_v6 = vadd.f32 %v1578_v21, %v966_v16  ;;  %v1267_v29 = vadd.f32 %v1266_v26, %v962_v13  ;;  %v1581_v7 = vadd.f32 %v1580_v27, %v1579_v23 }
 0x454   :  { %1789 = vtanh.f32 %v1310_v24  ;;  %v1313_v9 = vmul.f32 0.5, %v1265_v25 }
 0x455   :  { %1791 = vtanh.f32 %v1311_v28  ;;  %v1312_v30 = vmul.f32 0.5, %v1304_v6  ;;  %v1314_v31 = vmul.f32 0.5, %v1267_v29  ;;  %v1307_v32 = vadd.f32 %v1581_v7, %v966_v16 }
 0x456   :  { %1793 = vtanh.f32 %v1313_v9 }
 0x457   :  { %1795 = vtanh.f32 %v1312_v30  ;;  %v1315_v33 = vmul.f32 0.5, %v1307_v32 }
 0x458   :  { %1797 = vtanh.f32 %v1314_v31 }
 0x459   :  { %1799 = vtanh.f32 %v1315_v33 }
 0x45e   :  { %v1790_v34 = vpop.eup %1789 }
 0x45f   :  { %v1792_v35 = vpop.eup %1791  ;;  %v1322_v36 = vmul.f32 0.5, %v1790_v34 }
 0x460   :  { %v1794_v37 = vpop.eup %1793  ;;  %v1323_v38 = vmul.f32 0.5, %v1792_v35 }
 0x461   :  { %v1796_v39 = vpop.eup %1795  ;;  %v1328_v40 = vadd.f32 0.5, %v1322_v36  ;;  %v1325_v41 = vmul.f32 0.5, %v1794_v37 }
 0x462   :  { %v1798_v42 = vpop.eup %1797  ;;  %v1329_v43 = vadd.f32 0.5, %v1323_v38  ;;  %v1324_v44 = vmul.f32 0.5, %v1796_v39 }
 0x463   :  { %v1800_v45 = vpop.eup %1799  ;;  %v1331_v46 = vadd.f32 0.5, %v1325_v41  ;;  %v1326_v47 = vmul.f32 0.5, %v1798_v42 }
 0x464   :  { %v1530_v48 = vpack.c.bf16 %v1329_v43, %v1328_v40  ;;  %v1330_v49 = vadd.f32 0.5, %v1324_v44  ;;  %v1327_v50 = vmul.f32 0.5, %v1800_v45 }
 0x465   :  { %v1332_v51 = vadd.f32 0.5, %v1326_v47 }
 0x466   :  { %1354 = vst [vmem:[#allocation13] sm:$0xff] %v1530_v48  ;;  %v1531_v52 = vpack.c.bf16 %v1330_v49, %v1330_v49  ;;  %v1333_v53 = vadd.f32 0.5, %v1327_v50 }
 0x467   :  { %v1532_v54 = vpack.c.bf16 %v1332_v51, %v1331_v46 }
 0x468   :  { %1355 = vst [vmem:[#allocation13 + $0x8] sm:$0xf] %v1531_v52  ;;  %v1533_v55 = vpack.c.bf16 %v1333_v53, %v1333_v53 }
 0x469   :  { %1356 = vst [vmem:[#allocation13 + $0xc] sm:$0xff] %v1532_v54 }
 0x46a   :  { %1357 = vst [vmem:[#allocation13 + $0x14] sm:$0xf] %v1533_v55 }
 0x46b   :  { %1966 = shalt.err (!%p1963_p4)
}
 0x46c   :  { %s1967_s28 = scalar_lea.hbm %s2230_s10, 384 }
 0x46d   :  { %p1968_p5 = scmp.ne.s32.totalorder %s2230_s10, %s1967_s28  ;;  %p1971_p6 = scmp.lt.u32.totalorder %s1967_s28, %s2230_s10 }
 0x46f   :  { %p1973_p7 = pnand %p1971_p6, %p1968_p5 }
 0x471   :  { %1976 = shalt.err (!%p1973_p7)
}
 0x472   :  { %1369 = dma.vmem_to_hbm [thread:$0]  %s1364_s11, 384, %s2230_s10, [#allocation4], %s1994_s4, %s1994_s4, %s1995_s27  }
 0x473   :  { %1985 = dma.done.wait [#allocation4], 384  }
 0x474   :  { %1986 = vsyncadd [#allocation4], 4294966912 }
 0x475   :  { %1987 = dma.done.wait [#allocation15], 256  }
 0x476   :  { %1988 = vsyncadd [#allocation15], 4294967040 }
 0x477   :  { %1388 = vsyncpa [#allocation3], 1 }
 0x478   :  { %1389 = vsyncpa [#allocation6], 1 }
 0x479   :  { %1390 = vsyncpa [#allocation9], 1 }
 0x47a   :  { %1391 = vsyncpa [#allocation12], 1 }
 0x47b   :  { %1392 = vsyncpa [#allocation4], 1 }
 0x47c   :  { %1393 = vsyncpa [#allocation15], 1 }

</bundles_post_ra>
